<compile_context>
chip_gen: v7x
topology: tpu7x:2x2x1
jax: 0.10.0
libtpu: 0.0.40
codegen_flags: <defaults>
</compile_context>

<pallas_src>
import functools

import jax
import jax.numpy as jnp
from jax.experimental import pallas as pl
from jax.experimental.pallas import tpu as pltpu


def _flow_kernel(num_layers, eps,
                 xT_ref, wT_ref, uT_ref, b_ref, wu_ref,
                 xout_ref, logdet_ref):
    """One batch tile.

    xT_ref    : (D, TB)  x^T tile, batch on lanes              (VMEM)
    wT_ref    : (D, L)   W^T, all layers                       (VMEM)
    uT_ref    : (D, L)   U^T (already invertibility-adjusted)  (VMEM)
    b_ref     : (L,)     per-layer bias                        (SMEM scalars)
    wu_ref    : (L,)     per-layer  w_l . u_l                  (SMEM scalars)
    xout_ref  : (D, TB)  transformed x^T tile
    logdet_ref: (1, TB)  summed log|det| per batch column (lane dense)
    """
    x = xT_ref[...].astype(jnp.float32)                        # (D, TB)
    wT = wT_ref[...].astype(jnp.float32)                       # (D, L)
    uT = uT_ref[...].astype(jnp.float32)                       # (D, L)
    logdet = jnp.zeros((1, x.shape[1]), dtype=jnp.float32)

    # Planar flows use few layers (typically <= ~16) and the live set here is
    # only a handful of vregs (x tile + two (1, TB) rows), so a static Python
    # unroll is cheap and gives the LLO scheduler full visibility.  For very
    # deep flows this would switch to lax.fori_loop to bound code size.
    for l in range(num_layers):
        w_col = wT[:, l:l + 1]                                 # (D, 1)
        u_col = uT[:, l:l + 1]                                 # (D, 1)
        # a = w_l . x + b_l  -> tiny sublane reduce over D (<= 8 sublanes)
        a = jnp.sum(x * w_col, axis=0, keepdims=True) + b_ref[l]   # (1, TB)
        t = jnp.tanh(a)                                        # (1, TB)  EUP
        # log-det uses x BEFORE the transform (Flow.forward calls
        # get_logdet(x) before layer(x)); w_l . u_l precomputed in wrapper.
        det = jnp.abs(1.0 + (1.0 - t * t) * wu_ref[l])         # (1, TB)
        logdet = logdet + jnp.log(eps + det)
        # planar transformation
        x = x + u_col * t                                      # (D, TB)

    xout_ref[...] = x.astype(xout_ref.dtype)
    logdet_ref[...] = logdet.astype(logdet_ref.dtype)


def _adjust_u(u, w):
    """Vectorized PlanarTransformation.adjust_u over layers (param-only glue)."""
    wu = jnp.sum(u * w, axis=-1, keepdims=True)                # (L, 1)
    m_wu = -1.0 + jax.nn.softplus(wu)                          # stable log(1+exp)
    u_adj = u + (m_wu - wu) * w / jnp.sum(w * w, axis=-1, keepdims=True)
    return jnp.where(wu < -1.0, u_adj, u)


def _round_up(n, m):
    return ((n + m - 1) // m) * m


def _pick_batch_tile(batch, dim, max_tile, vmem_budget_bytes):
    """Largest multiple-of-128 batch tile whose double-buffered in+out x tiles
    plus the logdet row fit a VMEM budget safe on every generation (v7x has
    64 MiB physical / 32 MiB default-scoped VMEM; v5e/v6e have 128 MiB)."""
    d_pad = max(_round_up(dim, 8), 8)                          # sublane padding
    bytes_per_col = (2 * 2 * d_pad + 2 * 1) * 4                # x in/out dbl-buf + logdet
    cap = max(128, (vmem_budget_bytes // bytes_per_col) // 128 * 128)
    return min(max_tile, cap, _round_up(batch, 128))


def make_flow_params(dim, num_layers, key):
    """Deterministic synthetic init matching PlanarTransformation.__init__:
       u, w ~ Normal(0, 0.01), b = 0."""
    ku, kw = jax.random.split(key)
    U = 0.01 * jax.random.normal(ku, (num_layers, dim), dtype=jnp.float32)
    W = 0.01 * jax.random.normal(kw, (num_layers, dim), dtype=jnp.float32)
    Bv = jnp.zeros((num_layers,), dtype=jnp.float32)
    return U, W, Bv


@functools.partial(jax.jit, static_argnames=("eps", "block_batch"))
def flow_forward(x, U, W, Bv, eps=1e-8, block_batch=2048):
    """Pallas implementation of Flow.forward. Returns (x_transformed, logdet)."""
    B, D = x.shape
    L = U.shape[0]

    # Param-only glue: invertibility fix + batch-independent w_l . u_l.
    U = _adjust_u(U, W)
    wu = jnp.sum(U * W, axis=-1).astype(jnp.float32)           # (L,)

    # Lane-dense batch tile (multiple of 128), sized for the smallest-VMEM gen.
    tb = _pick_batch_tile(B, D, block_batch, vmem_budget_bytes=16 * 1024 * 1024)
    Bp = _round_up(B, tb)
    num_tiles = Bp // tb

    # Flip layout so batch maps to lanes; pad batch up to the tile grid.
    xT = jnp.pad(x.astype(jnp.float32), ((0, Bp - B), (0, 0))).T   # (D, Bp)
    WT = W.astype(jnp.float32).T                               # (D, L)
    UT = U.astype(jnp.float32).T                               # (D, L)

    kernel = functools.partial(_flow_kernel, L, eps)
    cost = pl.CostEstimate(
        flops=L * Bp * (4 * D + 6),
        transcendentals=2 * L * Bp,
        bytes_accessed=(2 * Bp * D + Bp + 2 * L * D + 2 * L) * 4,
    )

    xT_out, logdet_row = pl.pallas_call(
        kernel,
        grid=(num_tiles,),
        in_specs=[
            pl.BlockSpec((D, tb), lambda i: (0, i)),            # x^T batch tile
            pl.BlockSpec((D, L), lambda i: (0, 0)),             # W^T (all layers)
            pl.BlockSpec((D, L), lambda i: (0, 0)),             # U^T (all layers)
            pl.BlockSpec(memory_space=pltpu.MemorySpace.SMEM),  # b   (L,)
            pl.BlockSpec(memory_space=pltpu.MemorySpace.SMEM),  # w.u (L,)
        ],
        out_specs=(
            pl.BlockSpec((D, tb), lambda i: (0, i)),            # x^T out tile
            pl.BlockSpec((1, tb), lambda i: (0, i)),            # logdet row (lane dense)
        ),
        out_shape=(
            jax.ShapeDtypeStruct((D, Bp), jnp.float32),
            jax.ShapeDtypeStruct((1, Bp), jnp.float32),
        ),
        compiler_params=pltpu.CompilerParams(
            dimension_semantics=("parallel",),                  # megacore on v7x
            vmem_limit_bytes=32 * 1024 * 1024,
        ),
        cost_estimate=cost,
    )(xT, WT, UT, Bv.astype(jnp.float32), wu)

    x_out = xT_out[:, :B].T                                     # (B, D)
    logdet = logdet_row[0, :B].reshape(B, 1)                    # (B, 1)
    return x_out, logdet


def flow_forward_ref(x, U, W, Bv, eps=1e-8):
    """Pure-JAX reference (mirrors the PyTorch module) for validation."""
    U = _adjust_u(U, W)
    logdet = jnp.zeros((x.shape[0], 1), dtype=jnp.float32)
    for l in range(U.shape[0]):
        u, w, b = U[l], W[l], Bv[l]
        a = x @ w[:, None] + b
        t = jnp.tanh(a)
        jacob = (1.0 - t * t) * w[None, :]
        det = jnp.abs(1.0 + jacob @ u[:, None])
        logdet = logdet + jnp.log(eps + det)
        x = x + u[None, :] * t
    return x, logdet


if __name__ == "__main__":
    dim = 2
    num_layers = 4
    batch = 8

    key = jax.random.PRNGKey(0)
    kx, kp = jax.random.split(key)
    x = jax.random.normal(kx, (batch, dim), dtype=jnp.float32)
    U, W, Bv = make_flow_params(dim, num_layers, kp)

    x_out, logdet = flow_forward(x, U, W, Bv)
    jax.block_until_ready((x_out, logdet))

    # correctness check vs pure-JAX reference
    x_ref, ld_ref = flow_forward_ref(x, U, W, Bv)
    assert x_out.shape == (batch, dim) and logdet.shape == (batch, 1)
    assert jnp.allclose(x_out, x_ref, atol=1e-5, rtol=1e-5)
    assert jnp.allclose(logdet, ld_ref, atol=1e-5, rtol=1e-5)

    print("KERNEL_OK")
</pallas_src>

<mosaic_0001>
module attributes {stable_mosaic.version = 11 : i64} {
  func.func @_flow_kernel(%arg0: i32, %arg1: memref<2x128xf32, #tpu.memory_space<vmem>>, %arg2: memref<2x4xf32, #tpu.memory_space<vmem>>, %arg3: memref<2x4xf32, #tpu.memory_space<vmem>>, %arg4: memref<4xf32, #tpu.memory_space<smem>>, %arg5: memref<4xf32, #tpu.memory_space<smem>>, %arg6: memref<2x128xf32, #tpu.memory_space<vmem>>, %arg7: memref<1x128xf32, #tpu.memory_space<vmem>>) attributes {dimension_semantics = [#tpu.dimension_semantics<parallel>], iteration_bounds = array<i64: 1>, scalar_prefetch = 0 : i64, scratch_operands = 0 : i64, tpu.core_type = #tpu.core_type<tc>, window_params = [{transform_indices = @transform_0, window_bounds = array<i64: 2, 128>}, {pipeline_mode = #tpu.pipeline_mode<synchronous>, transform_indices = @transform_1, window_bounds = array<i64: 2, 4>}, {pipeline_mode = #tpu.pipeline_mode<synchronous>, transform_indices = @transform_2, window_bounds = array<i64: 2, 4>}, {transform_indices = @transform_3, window_bounds = array<i64: 4>}, {transform_indices = @transform_4, window_bounds = array<i64: 4>}, {transform_indices = @transform_5, window_bounds = array<i64: 2, 128>}, {transform_indices = @transform_6, window_bounds = array<i64: 1, 128>}]} {
    %c0 = arith.constant 0 : index
    %c0_0 = arith.constant 0 : index
    %0 = vector.load %arg1[%c0, %c0_0] : memref<2x128xf32, #tpu.memory_space<vmem>>, vector<2x128xf32>
    %c0_1 = arith.constant 0 : index
    %c0_2 = arith.constant 0 : index
    %1 = vector.load %arg2[%c0_1, %c0_2] : memref<2x4xf32, #tpu.memory_space<vmem>>, vector<2x4xf32>
    %c0_3 = arith.constant 0 : index
    %c0_4 = arith.constant 0 : index
    %2 = vector.load %arg3[%c0_3, %c0_4] : memref<2x4xf32, #tpu.memory_space<vmem>>, vector<2x4xf32>
    %cst = arith.constant 0.000000e+00 : f32
    %3 = vector.broadcast %cst : f32 to vector<1x128xf32>
    %4 = vector.extract_strided_slice %1 {offsets = [0, 0], sizes = [2, 1], strides = [1, 1]} : vector<2x4xf32> to vector<2x1xf32>
    %5 = vector.extract_strided_slice %2 {offsets = [0, 0], sizes = [2, 1], strides = [1, 1]} : vector<2x4xf32> to vector<2x1xf32>
    %6 = vector.broadcast %4 : vector<2x1xf32> to vector<2x128xf32>
    %7 = arith.mulf %0, %6 : vector<2x128xf32>
    %cst_5 = arith.constant dense<0.000000e+00> : vector<128xf32>
    %8 = vector.multi_reduction <add>, %7, %cst_5 [0] : vector<2x128xf32> to vector<128xf32>
    %9 = vector.shape_cast %8 : vector<128xf32> to vector<1x128xf32>
    %c0_6 = arith.constant 0 : index
    %10 = memref.load %arg4[%c0_6] : memref<4xf32, #tpu.memory_space<smem>>
    %11 = vector.broadcast %10 : f32 to vector<1x128xf32>
    %12 = arith.addf %9, %11 : vector<1x128xf32>
    %13 = math.tanh %12 : vector<1x128xf32>
    %14 = arith.mulf %13, %13 : vector<1x128xf32>
    %cst_7 = arith.constant 1.000000e+00 : f32
    %15 = vector.broadcast %cst_7 : f32 to vector<1x128xf32>
    %16 = arith.subf %15, %14 : vector<1x128xf32>
    %c0_8 = arith.constant 0 : index
    %17 = memref.load %arg5[%c0_8] : memref<4xf32, #tpu.memory_space<smem>>
    %18 = vector.broadcast %17 : f32 to vector<1x128xf32>
    %19 = arith.mulf %16, %18 : vector<1x128xf32>
    %cst_9 = arith.constant 1.000000e+00 : f32
    %20 = vector.broadcast %cst_9 : f32 to vector<1x128xf32>
    %21 = arith.addf %20, %19 : vector<1x128xf32>
    %22 = math.absf %21 : vector<1x128xf32>
    %cst_10 = arith.constant 9.99999993E-9 : f32
    %23 = vector.broadcast %cst_10 : f32 to vector<1x128xf32>
    %24 = arith.addf %23, %22 : vector<1x128xf32>
    %25 = math.log %24 : vector<1x128xf32>
    %26 = arith.addf %3, %25 : vector<1x128xf32>
    %27 = vector.broadcast %5 : vector<2x1xf32> to vector<2x128xf32>
    %28 = vector.broadcast %13 : vector<1x128xf32> to vector<2x128xf32>
    %29 = arith.mulf %27, %28 : vector<2x128xf32>
    %30 = arith.addf %0, %29 : vector<2x128xf32>
    %31 = vector.extract_strided_slice %1 {offsets = [0, 1], sizes = [2, 1], strides = [1, 1]} : vector<2x4xf32> to vector<2x1xf32>
    %32 = vector.extract_strided_slice %2 {offsets = [0, 1], sizes = [2, 1], strides = [1, 1]} : vector<2x4xf32> to vector<2x1xf32>
    %33 = vector.broadcast %31 : vector<2x1xf32> to vector<2x128xf32>
    %34 = arith.mulf %30, %33 : vector<2x128xf32>
    %cst_11 = arith.constant dense<0.000000e+00> : vector<128xf32>
    %35 = vector.multi_reduction <add>, %34, %cst_11 [0] : vector<2x128xf32> to vector<128xf32>
    %36 = vector.shape_cast %35 : vector<128xf32> to vector<1x128xf32>
    %c1 = arith.constant 1 : index
    %37 = memref.load %arg4[%c1] : memref<4xf32, #tpu.memory_space<smem>>
    %38 = vector.broadcast %37 : f32 to vector<1x128xf32>
    %39 = arith.addf %36, %38 : vector<1x128xf32>
    %40 = math.tanh %39 : vector<1x128xf32>
    %41 = arith.mulf %40, %40 : vector<1x128xf32>
    %cst_12 = arith.constant 1.000000e+00 : f32
    %42 = vector.broadcast %cst_12 : f32 to vector<1x128xf32>
    %43 = arith.subf %42, %41 : vector<1x128xf32>
    %c1_13 = arith.constant 1 : index
    %44 = memref.load %arg5[%c1_13] : memref<4xf32, #tpu.memory_space<smem>>
    %45 = vector.broadcast %44 : f32 to vector<1x128xf32>
    %46 = arith.mulf %43, %45 : vector<1x128xf32>
    %cst_14 = arith.constant 1.000000e+00 : f32
    %47 = vector.broadcast %cst_14 : f32 to vector<1x128xf32>
    %48 = arith.addf %47, %46 : vector<1x128xf32>
    %49 = math.absf %48 : vector<1x128xf32>
    %cst_15 = arith.constant 9.99999993E-9 : f32
    %50 = vector.broadcast %cst_15 : f32 to vector<1x128xf32>
    %51 = arith.addf %50, %49 : vector<1x128xf32>
    %52 = math.log %51 : vector<1x128xf32>
    %53 = arith.addf %26, %52 : vector<1x128xf32>
    %54 = vector.broadcast %32 : vector<2x1xf32> to vector<2x128xf32>
    %55 = vector.broadcast %40 : vector<1x128xf32> to vector<2x128xf32>
    %56 = arith.mulf %54, %55 : vector<2x128xf32>
    %57 = arith.addf %30, %56 : vector<2x128xf32>
    %58 = vector.extract_strided_slice %1 {offsets = [0, 2], sizes = [2, 1], strides = [1, 1]} : vector<2x4xf32> to vector<2x1xf32>
    %59 = vector.extract_strided_slice %2 {offsets = [0, 2], sizes = [2, 1], strides = [1, 1]} : vector<2x4xf32> to vector<2x1xf32>
    %60 = vector.broadcast %58 : vector<2x1xf32> to vector<2x128xf32>
    %61 = arith.mulf %57, %60 : vector<2x128xf32>
    %cst_16 = arith.constant dense<0.000000e+00> : vector<128xf32>
    %62 = vector.multi_reduction <add>, %61, %cst_16 [0] : vector<2x128xf32> to vector<128xf32>
    %63 = vector.shape_cast %62 : vector<128xf32> to vector<1x128xf32>
    %c2 = arith.constant 2 : index
    %64 = memref.load %arg4[%c2] : memref<4xf32, #tpu.memory_space<smem>>
    %65 = vector.broadcast %64 : f32 to vector<1x128xf32>
    %66 = arith.addf %63, %65 : vector<1x128xf32>
    %67 = math.tanh %66 : vector<1x128xf32>
    %68 = arith.mulf %67, %67 : vector<1x128xf32>
    %cst_17 = arith.constant 1.000000e+00 : f32
    %69 = vector.broadcast %cst_17 : f32 to vector<1x128xf32>
    %70 = arith.subf %69, %68 : vector<1x128xf32>
    %c2_18 = arith.constant 2 : index
    %71 = memref.load %arg5[%c2_18] : memref<4xf32, #tpu.memory_space<smem>>
    %72 = vector.broadcast %71 : f32 to vector<1x128xf32>
    %73 = arith.mulf %70, %72 : vector<1x128xf32>
    %cst_19 = arith.constant 1.000000e+00 : f32
    %74 = vector.broadcast %cst_19 : f32 to vector<1x128xf32>
    %75 = arith.addf %74, %73 : vector<1x128xf32>
    %76 = math.absf %75 : vector<1x128xf32>
    %cst_20 = arith.constant 9.99999993E-9 : f32
    %77 = vector.broadcast %cst_20 : f32 to vector<1x128xf32>
    %78 = arith.addf %77, %76 : vector<1x128xf32>
    %79 = math.log %78 : vector<1x128xf32>
    %80 = arith.addf %53, %79 : vector<1x128xf32>
    %81 = vector.broadcast %59 : vector<2x1xf32> to vector<2x128xf32>
    %82 = vector.broadcast %67 : vector<1x128xf32> to vector<2x128xf32>
    %83 = arith.mulf %81, %82 : vector<2x128xf32>
    %84 = arith.addf %57, %83 : vector<2x128xf32>
    %85 = vector.extract_strided_slice %1 {offsets = [0, 3], sizes = [2, 1], strides = [1, 1]} : vector<2x4xf32> to vector<2x1xf32>
    %86 = vector.extract_strided_slice %2 {offsets = [0, 3], sizes = [2, 1], strides = [1, 1]} : vector<2x4xf32> to vector<2x1xf32>
    %87 = vector.broadcast %85 : vector<2x1xf32> to vector<2x128xf32>
    %88 = arith.mulf %84, %87 : vector<2x128xf32>
    %cst_21 = arith.constant dense<0.000000e+00> : vector<128xf32>
    %89 = vector.multi_reduction <add>, %88, %cst_21 [0] : vector<2x128xf32> to vector<128xf32>
    %90 = vector.shape_cast %89 : vector<128xf32> to vector<1x128xf32>
    %c3 = arith.constant 3 : index
    %91 = memref.load %arg4[%c3] : memref<4xf32, #tpu.memory_space<smem>>
    %92 = vector.broadcast %91 : f32 to vector<1x128xf32>
    %93 = arith.addf %90, %92 : vector<1x128xf32>
    %94 = math.tanh %93 : vector<1x128xf32>
    %95 = arith.mulf %94, %94 : vector<1x128xf32>
    %cst_22 = arith.constant 1.000000e+00 : f32
    %96 = vector.broadcast %cst_22 : f32 to vector<1x128xf32>
    %97 = arith.subf %96, %95 : vector<1x128xf32>
    %c3_23 = arith.constant 3 : index
    %98 = memref.load %arg5[%c3_23] : memref<4xf32, #tpu.memory_space<smem>>
    %99 = vector.broadcast %98 : f32 to vector<1x128xf32>
    %100 = arith.mulf %97, %99 : vector<1x128xf32>
    %cst_24 = arith.constant 1.000000e+00 : f32
    %101 = vector.broadcast %cst_24 : f32 to vector<1x128xf32>
    %102 = arith.addf %101, %100 : vector<1x128xf32>
    %103 = math.absf %102 : vector<1x128xf32>
    %cst_25 = arith.constant 9.99999993E-9 : f32
    %104 = vector.broadcast %cst_25 : f32 to vector<1x128xf32>
    %105 = arith.addf %104, %103 : vector<1x128xf32>
    %106 = math.log %105 : vector<1x128xf32>
    %107 = arith.addf %80, %106 : vector<1x128xf32>
    %108 = vector.broadcast %86 : vector<2x1xf32> to vector<2x128xf32>
    %109 = vector.broadcast %94 : vector<1x128xf32> to vector<2x128xf32>
    %110 = arith.mulf %108, %109 : vector<2x128xf32>
    %111 = arith.addf %84, %110 : vector<2x128xf32>
    %c0_26 = arith.constant 0 : index
    %c0_27 = arith.constant 0 : index
    %112 = vector.load %arg6[%c0_26, %c0_27] : memref<2x128xf32, #tpu.memory_space<vmem>>, vector<2x128xf32>
    tpu.vector_store %arg6[%c0_26, %c0_27], %111 {strides = array<i32>} : memref<2x128xf32, #tpu.memory_space<vmem>>, vector<2x128xf32>,
    %c0_28 = arith.constant 0 : index
    %c0_29 = arith.constant 0 : index
    %113 = vector.load %arg7[%c0_28, %c0_29] : memref<1x128xf32, #tpu.memory_space<vmem>>, vector<1x128xf32>
    tpu.vector_store %arg7[%c0_28, %c0_29], %107 {strides = array<i32>} : memref<1x128xf32, #tpu.memory_space<vmem>>, vector<1x128xf32>,
    return
  }
  func.func @transform_0(%arg0: i32) -> (i32, i32) {
    %c0_i32 = arith.constant 0 : i32
    %c0_i32_0 = arith.constant 0 : i32
    return %c0_i32, %arg0 : i32, i32
  }
  func.func @transform_1(%arg0: i32) -> (i32, i32) {
    %c0_i32 = arith.constant 0 : i32
    %c0_i32_0 = arith.constant 0 : i32
    %c0_i32_1 = arith.constant 0 : i32
    return %c0_i32, %c0_i32_0 : i32, i32
  }
  func.func @transform_2(%arg0: i32) -> (i32, i32) {
    %c0_i32 = arith.constant 0 : i32
    %c0_i32_0 = arith.constant 0 : i32
    %c0_i32_1 = arith.constant 0 : i32
    return %c0_i32, %c0_i32_0 : i32, i32
  }
  func.func @transform_3(%arg0: i32) -> i32 {
    %c0_i32 = arith.constant 0 : i32
    %c0_i32_0 = arith.constant 0 : i32
    return %c0_i32 : i32
  }
  func.func @transform_4(%arg0: i32) -> i32 {
    %c0_i32 = arith.constant 0 : i32
    %c0_i32_0 = arith.constant 0 : i32
    return %c0_i32 : i32
  }
  func.func @transform_5(%arg0: i32) -> (i32, i32) {
    %c0_i32 = arith.constant 0 : i32
    %c0_i32_0 = arith.constant 0 : i32
    return %c0_i32, %arg0 : i32, i32
  }
  func.func @transform_6(%arg0: i32) -> (i32, i32) {
    %c0_i32 = arith.constant 0 : i32
    %c0_i32_0 = arith.constant 0 : i32
    return %c0_i32, %arg0 : i32, i32
  }
}

</mosaic_0001>

<bundles_post_ra>
// kernel: flow_forward.1
= control target key start
LH: loop header
LB: loop body
LE: loop exit
PB: predicated region body
PF: predicated region fallthrough
CT: control target
= control target key end

     0   :  { %12 = vsyncpa [#allocation3], 0  ;;  %s325_s0 = inlined_call_operand.vmem [shape: f32[2,128], index: 0, kind: input, shape index: {}]   ;;  %s326_s1 = inlined_call_operand.vmem [shape: f32[2,4], index: 1, kind: input, shape index: {}]   ;;  %s327_s2 = inlined_call_operand.vmem [shape: f32[2,4], index: 2, kind: input, shape index: {}]   ;;  %s328_s3 = inlined_call_operand.vmem [shape: f32[4], index: 3, kind: input, shape index: {}]   ;;  %s329_s4 = inlined_call_operand.vmem [shape: f32[4], index: 4, kind: input, shape index: {}]   ;;  %s330_s5 = inlined_call_operand.vmem [shape: f32[2,128], index: 5, kind: output, shape index: {0}]   ;;  %s331_s6 = inlined_call_operand.vmem [shape: f32[1,128], index: 6, kind: output, shape index: {1}]  }
   0x1   :  { %s26_s23 = sshll.u32 %s328_s3, 4  ;;  %s27_s23 = int_to_ptr.vmem [resolvable:$true] %s26_s23 }
   0x2   :  { %13 = vsyncpa [#allocation5], 0  ;;  %s36_s26 = sshll.u32 %s329_s4, 4  ;;  %s231_s27 = scalar_lea.vmem %s27_s23, 16  ;;  %s37_s26 = int_to_ptr.vmem [resolvable:$true] %s36_s26 }
   0x3   :  { %p232_p0 = scmp.ne.s32.totalorder %s27_s23, %s231_s27  ;;  %p236_p1 = scmp.lt.s32.totalorder %s27_s23, %s27_s23 }
   0x4   :  { %p237_p2 = scmp.lt.s32.totalorder %s231_s27, %s231_s27 }
   0x6   :  { %p238_p3 = por %p237_p2, %p236_p1 }
   0x8   :  { %p239_p4 = pnand %p238_p3, %p232_p0 }
   0xa   :  { %242 = shalt.err (!%p239_p4)
}
   0xb   :  { %s259_s28 = smov [#allocation2]   ;;  %s243_s29 = scalar_lea.vmem %s37_s26, 16 }
   0xc   :  { %29 = dma.vmem_to_smem %s27_s23, 16, %s259_s28, [#allocation3]  }
   0xd   :  { %p244_p5 = scmp.ne.s32.totalorder %s37_s26, %s243_s29  ;;  %p248_p6 = scmp.lt.s32.totalorder %s37_s26, %s37_s26 }
   0xe   :  { %p249_p7 = scmp.lt.s32.totalorder %s243_s29, %s243_s29 }
  0x10   :  { %p250_p8 = por %p249_p7, %p248_p6 }
  0x12   :  { %p251_p9 = pnand %p250_p8, %p244_p5 }
  0x14   :  { %254 = shalt.err (!%p251_p9)
}
  0x15   :  { %s260_s3 = smov [#allocation4]  }
  0x16   :  { %39 = dma.vmem_to_smem %s37_s26, 16, %s260_s3, [#allocation5]  }
  0x17   :  { %255 = dma.done.wait [#allocation3], 16  }
  0x18   :  { %256 = vsyncadd [#allocation3], 4294967280 }
  0x19   :  { %257 = dma.done.wait [#allocation5], 16  }
  0x1a   :  { %258 = vsyncadd [#allocation5], 4294967280 }
  0x1b   :  { %46 = sfence }
  0x1c   :  { %v48_v0 = vld [vmem:[%s326_s1] sm:$0x3]  ;;  %v261_v1 = vmov 0   ;;  %v262_v2 = vmov 1   ;;  %v263_v4 = vmov 2   ;;  %v264_v5 = vmov 3  }
  0x1d   :  { %209 = vset.pattern.permute.xlu0 %v261_v1  ;;  %210 = vset.pattern.permute.xlu1 %v262_v2  ;;  %v49_v3 = vld [vmem:[%s327_s2] sm:$0x3]  ;;  %vm56_vm0 = vcmask 1041408   ;;  %s64_s2 = sld [smem:[#allocation2]]  ;;  %s198_s11 = sld [smem:[#allocation4 + $0x1]] }
  0x1e   :  { %52 = vperm.xlu0 %209, %v48_v0   ;;  %87 = vperm.xlu1 %210, %v48_v0   ;;  %v47_v6 = vld [vmem:[%s325_s0] sm:$0x3]  ;;  %s197_s0 = sld [smem:[#allocation2 + $0x1]]  ;;  %s70_s10 = sld [smem:[#allocation4]] }
  0x1f   :  { %s199_s12 = sld [smem:[#allocation2 + $0x2]]  ;;  %s201_s13 = sld [smem:[#allocation2 + $0x3]] }
  0x20   :  { %s200_s14 = sld [smem:[#allocation4 + $0x2]]  ;;  %s202_s15 = sld [smem:[#allocation4 + $0x3]] }
  0x22   :  { %81 = vperm.xlu0 %209, %v49_v3   ;;  %114 = vperm.xlu1 %210, %v49_v3  }
  0x23   :  { %v65_v15 = vstv %s64_s2  ;;  %v105_v42 = vstv %s198_s11 }
  0x24   :  { %v99_v30 = vstv %s197_s0  ;;  %v71_v35 = vstv %s70_s10 }
  0x25   :  { %v132_v59 = vstv %s199_s12 }
  0x26   :  { %211 = vset.pattern.permute.xlu0 %v263_v4  ;;  %212 = vset.pattern.permute.xlu1 %v263_v4 }
  0x27   :  { %120 = vperm.xlu0 %211, %v48_v0   ;;  %147 = vperm.xlu1 %212, %v49_v3  }
  0x2b   :  { %213 = vset.pattern.permute.xlu1 %v264_v5  ;;  %214 = vset.pattern.permute.xlu0 %v264_v5 }
  0x2c   :  { %153 = vperm.xlu1 %213, %v48_v0   ;;  %180 = vperm.xlu0 %214, %v49_v3  }
  0x9d   :  { %v53_v7 = vpop.permute.xlu0 %52  ;;  %v88_v22 = vpop.permute.xlu1 %87 }
  0x9e   :  { %v55_v8 = vmul.f32 %v53_v7, %v47_v6 }
  0xa0   :  { %v57_v9 = vsel %vm56_vm0, %v55_v8, 0.0 }
  0xa1   :  { %v58_v10 = vrot.slane %v57_v9, 4  ;;  %v82_v19 = vpop.permute.xlu0 %81  ;;  %v115_v39 = vpop.permute.xlu1 %114 }
  0xa3   :  { %v59_v11 = vadd.f32 %v58_v10, %v57_v9 }
  0xa5   :  { %v60_v12 = vrot.slane %v59_v11, 2 }
  0xa6   :  { %v121_v43 = vpop.permute.xlu0 %120  ;;  %v148_v3 = vpop.permute.xlu1 %147 }
  0xa7   :  { %v61_v13 = vadd.f32 %v60_v12, %v59_v11 }
  0xa9   :  { %v62_v14 = vrot.slane %v61_v13, 1 }
  0xab   :  { %v63_v16 = vadd.f32 %v62_v14, %v61_v13 }
  0xad   :  { %v66_v17 = vadd.f32 %v65_v15, %v63_v16  ;;  %v165_v16 = vstv %s201_s13 }
  0xaf   :  { %215 = vtanh.f32 %v66_v17 }
  0xb9   :  { %v216_v18 = vpop.eup %215 }
  0xba   :  { %v84_v20 = vmul.f32 %v216_v18, %v82_v19  ;;  %v68_v32 = vmul.f32 %v216_v18, %v216_v18  ;;  %v138_v19 = vstv %s200_s14 }
  0xbc   :  { %v85_v21 = vadd.f32 %v84_v20, %v47_v6  ;;  %v69_v34 = vsub.f32 1.0, %v68_v32  ;;  %v154_v6 = vpop.permute.xlu1 %153 }
  0xbe   :  { %v90_v23 = vmul.f32 %v88_v22, %v85_v21  ;;  %v72_v36 = vmul.f32 %v71_v35, %v69_v34 }
  0xc0   :  { %v91_v24 = vsel %vm56_vm0, %v90_v23, 0.0  ;;  %v73_v37 = vadd.f32 1.0, %v72_v36  ;;  %v181_v23 = vpop.permute.xlu0 %180 }
  0xc1   :  { %v92_v25 = vrot.slane %v91_v24, 4 }
  0xc2   :  { %v74_v44 = vand.u32 2147483647, %v73_v37 }
  0xc3   :  { %v93_v26 = vadd.f32 %v92_v25, %v91_v24 }
  0xc4   :  { %v75_v49 = vadd.f32 1e-08, %v74_v44 }
  0xc5   :  { %v94_v27 = vrot.slane %v93_v26, 2 }
  0xc7   :  { %v95_v28 = vadd.f32 %v94_v27, %v93_v26 }
  0xc9   :  { %v96_v29 = vrot.slane %v95_v28, 1 }
  0xcb   :  { %v97_v31 = vadd.f32 %v96_v29, %v95_v28  ;;  %v171_v28 = vstv %s202_s15 }
  0xcd   :  { %v100_v33 = vadd.f32 %v99_v30, %v97_v31 }
  0xcf   :  { %217 = vtanh.f32 %v100_v33 }
  0xd0   :  { %219 = vlog2.f32 %v75_v49 }
  0xd9   :  { %v218_v38 = vpop.eup %217 }
  0xda   :  { %v102_v40 = vmul.f32 %v218_v38, %v218_v38  ;;  %v117_v41 = vmul.f32 %v218_v38, %v115_v39  ;;  %v220_v62 = vpop.eup %219 }
  0xdb   :  { %v77_v0 = vmul.f32 0.6931472, %v220_v62 }
  0xdc   :  { %v103_v45 = vsub.f32 1.0, %v102_v40  ;;  %v118_v46 = vadd.f32 %v117_v41, %v85_v21 }
  0xde   :  { %v106_v47 = vmul.f32 %v105_v42, %v103_v45  ;;  %v123_v48 = vmul.f32 %v121_v43, %v118_v46 }
  0xe0   :  { %v107_v50 = vadd.f32 1.0, %v106_v47  ;;  %v124_v51 = vsel %vm56_vm0, %v123_v48, 0.0 }
  0xe1   :  { %v125_v52 = vrot.slane %v124_v51, 4 }
  0xe2   :  { %v108_v53 = vand.u32 2147483647, %v107_v50 }
  0xe3   :  { %v126_v54 = vadd.f32 %v125_v52, %v124_v51 }
  0xe4   :  { %v109_v55 = vadd.f32 1e-08, %v108_v53 }
  0xe5   :  { %v127_v56 = vrot.slane %v126_v54, 2 }
  0xe6   :  { %221 = vlog2.f32 %v109_v55 }
  0xe7   :  { %v128_v57 = vadd.f32 %v127_v56, %v126_v54 }
  0xe9   :  { %v129_v58 = vrot.slane %v128_v57, 1 }
  0xeb   :  { %v130_v60 = vadd.f32 %v129_v58, %v128_v57 }
  0xed   :  { %v133_v61 = vadd.f32 %v132_v59, %v130_v60 }
  0xef   :  { %223 = vtanh.f32 %v133_v61 }
  0xf0   :  { %v222_v63 = vpop.eup %221 }
  0xf1   :  { %v111_v1 = vmul.f32 0.6931472, %v222_v63 }
  0xf3   :  { %v112_v2 = vadd.f32 %v111_v1, %v77_v0 }
  0xf9   :  { %v224_v4 = vpop.eup %223 }
  0xfa   :  { %v150_v5 = vmul.f32 %v224_v4, %v148_v3  ;;  %v135_v14 = vmul.f32 %v224_v4, %v224_v4 }
  0xfc   :  { %v151_v7 = vadd.f32 %v150_v5, %v118_v46  ;;  %v136_v18 = vsub.f32 1.0, %v135_v14 }
  0xfe   :  { %v156_v8 = vmul.f32 %v154_v6, %v151_v7  ;;  %v139_v21 = vmul.f32 %v138_v19, %v136_v18 }
 0x100   :  { %v157_v9 = vsel %vm56_vm0, %v156_v8, 0.0  ;;  %v140_v22 = vadd.f32 1.0, %v139_v21 }
 0x101   :  { %v158_v10 = vrot.slane %v157_v9, 4 }
 0x102   :  { %v141_v24 = vand.u32 2147483647, %v140_v22 }
 0x103   :  { %v159_v11 = vadd.f32 %v158_v10, %v157_v9 }
 0x104   :  { %v142_v29 = vadd.f32 1e-08, %v141_v24 }
 0x105   :  { %v160_v12 = vrot.slane %v159_v11, 2 }
 0x107   :  { %v161_v13 = vadd.f32 %v160_v12, %v159_v11 }
 0x109   :  { %v162_v15 = vrot.slane %v161_v13, 1 }
 0x10b   :  { %v163_v17 = vadd.f32 %v162_v15, %v161_v13 }
 0x10d   :  { %v166_v20 = vadd.f32 %v165_v16, %v163_v17 }
 0x10f   :  { %225 = vtanh.f32 %v166_v20 }
 0x110   :  { %227 = vlog2.f32 %v142_v29 }
 0x119   :  { %v226_v25 = vpop.eup %225 }
 0x11a   :  { %v168_v26 = vmul.f32 %v226_v25, %v226_v25  ;;  %v183_v27 = vmul.f32 %v226_v25, %v181_v23  ;;  %v228_v36 = vpop.eup %227 }
 0x11b   :  { %v144_v37 = vmul.f32 0.6931472, %v228_v36 }
 0x11c   :  { %v169_v30 = vsub.f32 1.0, %v168_v26  ;;  %v184_v31 = vadd.f32 %v183_v27, %v151_v7 }
 0x11d   :  { %v145_v39 = vadd.f32 %v144_v37, %v112_v2 }
 0x11e   :  { %v172_v32 = vmul.f32 %v171_v28, %v169_v30  ;;  %185 = vst [vmem:[%s330_s5] sm:$0x3] %v184_v31 }
 0x120   :  { %v173_v33 = vadd.f32 1.0, %v172_v32 }
 0x122   :  { %v174_v34 = vand.u32 2147483647, %v173_v33 }
 0x124   :  { %v175_v35 = vadd.f32 1e-08, %v174_v34 }
 0x126   :  { %229 = vlog2.f32 %v175_v35 }
 0x130   :  { %v230_v38 = vpop.eup %229 }
 0x131   :  { %v177_v40 = vmul.f32 0.6931472, %v230_v38 }
 0x133   :  { %v178_v41 = vadd.f32 %v177_v40, %v145_v39 }
 0x135   :  { %186 = vst [vmem:[%s331_s6] sm:$0x1] %v178_v41 }
 0x136   :  { %195 = vsyncpa [#allocation3], 1 }
 0x137   :  { %196 = vsyncpa [#allocation5], 1 }

</bundles_post_ra>
